<compile_context>
chip_gen: v5e
topology: v5e:2x2
jax: 0.10.0
libtpu: 0.0.40
codegen_flags: <defaults>
</compile_context>

<pallas_src>
import functools

import jax
import jax.numpy as jnp
from jax.experimental import pallas as pl
from jax.experimental.pallas import tpu as pltpu


def _round_up(x, m):
    return (x + m - 1) // m * m


# ----------------------------------------------------------------------------
# Pallas kernels
# ----------------------------------------------------------------------------
def _backbone_kernel(p_ref, ws_ref, bs_ref, wb_ref, bb_ref, wh_ref,
                     hp_ref, psum_ref, *, tm, s_valid):
    """Fused backbone tile:
         stem conv (pixel normalization folded) -> relu -> 1x1 conv -> relu
         -> head 1x1 conv partial (feat @ w_head, gc-independent term)
       plus masked per-tile row sums of `feat` for the GCM global average pool.
       `feat` never leaves VMEM."""
    x = p_ref[...]                                             # bf16 (tm, kp)
    y1 = jnp.dot(x, ws_ref[...], preferred_element_type=jnp.float32)
    y1 = jnp.maximum(y1 + bs_ref[...], 0.0)                    # f32 bias+relu
    feat = jnp.dot(y1.astype(jnp.bfloat16), wb_ref[...],
                   preferred_element_type=jnp.float32)
    feat = jnp.maximum(feat + bb_ref[...], 0.0)                # f32 (tm, cp)

    # gc-independent head term; the (gc @ w_head + b_head) bias is added later.
    hp = jnp.dot(feat.astype(jnp.bfloat16), wh_ref[...],
                 preferred_element_type=jnp.float32)
    hp_ref[...] = hp.astype(hp_ref.dtype)                      # bf16 store

    # Partial sums for global average pooling; rows beyond the valid spatial
    # extent of this image (ragged-tail padding) are masked out (they are
    # non-zero after bias + relu).
    t = pl.program_id(1)
    row = t * tm + jax.lax.broadcasted_iota(jnp.int32, (tm, 1), 0)
    feat_masked = jnp.where(row < s_valid, feat, 0.0)
    psum_ref[...] = jnp.sum(feat_masked, axis=0, keepdims=True)[None]


def _gcm_head_bias_kernel(pooled_ref, wg_ref, bg_ref, wh_ref, bh_ref, o_ref):
    """GlobalContextModule 1x1 conv on the pooled (B, C) tensor, immediately
    folded through the head weight:  out = relu(pooled @ w_gc + b_gc) @ w_head
    + b_head.  This is the per-image head bias; tiny (B x 128 x 128)."""
    gc = jnp.dot(pooled_ref[...].astype(jnp.bfloat16), wg_ref[...],
                 preferred_element_type=jnp.float32)
    gc = jnp.maximum(gc + bg_ref[...], 0.0)
    hb = jnp.dot(gc.astype(jnp.bfloat16), wh_ref[...],
                 preferred_element_type=jnp.float32)
    o_ref[...] = hb + bh_ref[...]


# ----------------------------------------------------------------------------
# Pallas wrappers
# ----------------------------------------------------------------------------
def backbone_fused(patches, w_stem, b_stem, w_bb, b_bb, w_head, *, batch,
                   s_pad, tm, s_valid):
    m_pad, kp = patches.shape
    cp = w_bb.shape[0]
    nh = w_head.shape[1]
    n_tiles = s_pad // tm
    kern = functools.partial(_backbone_kernel, tm=tm, s_valid=s_valid)
    hp, psum = pl.pallas_call(
        kern,
        out_shape=(
            jax.ShapeDtypeStruct((m_pad, nh), jnp.bfloat16),
            jax.ShapeDtypeStruct((batch * n_tiles, 1, cp), jnp.float32),
        ),
        grid=(batch, n_tiles),
        in_specs=[
            pl.BlockSpec((tm, kp), lambda b, t: (b * n_tiles + t, 0)),
            pl.BlockSpec((kp, cp), lambda b, t: (0, 0)),
            pl.BlockSpec((1, cp), lambda b, t: (0, 0)),
            pl.BlockSpec((cp, cp), lambda b, t: (0, 0)),
            pl.BlockSpec((1, cp), lambda b, t: (0, 0)),
            pl.BlockSpec((cp, nh), lambda b, t: (0, 0)),
        ],
        out_specs=(
            pl.BlockSpec((tm, nh), lambda b, t: (b * n_tiles + t, 0)),
            pl.BlockSpec((1, 1, cp), lambda b, t: (b * n_tiles + t, 0, 0)),
        ),
        compiler_params=pltpu.CompilerParams(
            dimension_semantics=("parallel", "parallel")),
    )(patches, w_stem, b_stem, w_bb, b_bb, w_head)
    return hp, psum


def gcm_head_bias(pooled, w_gc, b_gc, w_head, b_head):
    bsz = pooled.shape[0]
    nh = w_head.shape[1]
    return pl.pallas_call(
        _gcm_head_bias_kernel,
        out_shape=jax.ShapeDtypeStruct((bsz, nh), jnp.float32),
    )(pooled, w_gc, b_gc, w_head, b_head)


# ----------------------------------------------------------------------------
# Parameter construction (deterministic, synthetic) + inference-time prep
# ----------------------------------------------------------------------------
def make_params(key, c_in=3, c_feat=64, num_classes=19, stem_stride=4):
    k = jax.random.split(key, 5)
    k_patch = stem_stride * stem_stride * c_in          # 48
    n_head = num_classes + 1 + 2 + 1                    # sem_seg | center | offset | depth
    return {
        # Cityscapes-style ImageNet statistics, stored as mean/255, std/255
        # exactly like the module's registered buffers.
        "pixel_mean": (jnp.array([[123.675, 116.28, 103.53]], jnp.float32) / 255.0),
        "pixel_std": (jnp.array([[58.395, 57.12, 57.375]], jnp.float32) / 255.0),
        # w_stem rows are in PyTorch conv-weight flattening order (c, ky, kx).
        "w_stem": jax.random.normal(k[0], (k_patch, c_feat), jnp.float32) * 0.05,
        "b_stem": jnp.zeros((1, c_feat), jnp.float32),
        "w_bb": jax.random.normal(k[1], (c_feat, c_feat), jnp.float32) * 0.05,
        "b_bb": jnp.zeros((1, c_feat), jnp.float32),
        "w_gc": jax.random.normal(k[2], (c_feat, c_feat), jnp.float32) * 0.05,
        "b_gc": jnp.zeros((1, c_feat), jnp.float32),
        "w_head": jax.random.normal(k[3], (c_feat, n_head), jnp.float32) * 0.05,
        "b_head": jnp.zeros((1, n_head), jnp.float32),
        "num_classes": num_classes,
        "stem_stride": stem_stride,
    }


def prepare_inference_params(params):
    """Fold pixel normalization into the stem conv, zero-pad every channel dim
    to a multiple of 128 lanes and pre-cast matmul weights to bf16 (biases stay
    f32; accumulation is f32 so only the factors are rounded).  Math is
    unchanged: the folded stem reproduces ((x/255 - mean/255)/(std/255)) @ w."""
    s = params["stem_stride"]
    pm = params["pixel_mean"][0]           # mean / 255, shape (Cin,)
    ps = params["pixel_std"][0]            # std  / 255, shape (Cin,)
    n_patch = params["w_stem"].shape[0]
    # Patch feature ordering is (c, dy, dx): channel slowest, so per-channel
    # scale/shift repeat contiguously s*s times.
    scale = jnp.repeat(1.0 / (255.0 * ps), s * s)        # (Cin*s*s,)
    shift = jnp.repeat(pm / ps, s * s)                   # (Cin*s*s,)
    w_stem = params["w_stem"] * scale[:, None]
    b_stem = params["b_stem"] - shift[None, :] @ params["w_stem"]

    c_feat = params["w_bb"].shape[0]
    cp = _round_up(c_feat, 128)
    n_head = params["w_head"].shape[1]
    n_head_pad = _round_up(n_head, 128)

    def pad_to(a, rows, cols):
        return jnp.pad(a, ((0, rows - a.shape[0]), (0, cols - a.shape[1])))

    return {
        "w_stem_f": pad_to(w_stem, n_patch, cp).astype(jnp.bfloat16),
        "b_stem_f": pad_to(b_stem, 1, cp),
        "w_bb_p": pad_to(params["w_bb"], cp, cp).astype(jnp.bfloat16),
        "b_bb_p": pad_to(params["b_bb"], 1, cp),
        "w_gc_p": pad_to(params["w_gc"], cp, cp).astype(jnp.bfloat16),
        "b_gc_p": pad_to(params["b_gc"], 1, cp),
        "w_head_p": pad_to(params["w_head"], cp, n_head_pad).astype(jnp.bfloat16),
        "b_head_p": pad_to(params["b_head"], 1, n_head_pad),
        "num_classes": params["num_classes"],
        "stem_stride": s,
        "n_head": n_head,
    }


# ----------------------------------------------------------------------------
# MGNet forward (inference: normalize(folded) -> backbone -> GCM -> heads)
# ----------------------------------------------------------------------------
def mgnet_forward(images_nchw, inf_params):
    """images_nchw: raw 0-255 float images, (B, 3, H, W) like the PyTorch
    module.  All matmuls run bf16 x bf16 with f32 accumulation; pixel values
    0..255 are exact in bf16 for real uint8 inputs."""
    B, Cin, H, W = images_nchw.shape
    s = inf_params["stem_stride"]
    num_classes = inf_params["num_classes"]
    n_head = inf_params["n_head"]
    assert H % s == 0 and W % s == 0, "size_divisibility padding assumed upstream"
    H4, W4 = H // s, W // s
    S = H4 * W4

    # Balanced row tiles: ~<=1024 rows each, padding < 16 rows per image.  The
    # ragged tail is zero-padded and masked inside the kernel.
    max_tile = 1024
    n_tiles = -(-S // max_tile)
    tm = _round_up(-(-S // n_tiles), 16)
    s_pad = tm * n_tiles

    # Patchify NCHW -> (B*S_pad, Cin*s*s) bf16 tokens, feature order (c, dy, dx)
    # (matches w_stem row order), keeping the image's innermost axis contiguous.
    # TODO(synk): the 4x4 patch gather could be expressed via a BlockSpec
    #             index_map over image rows to remove this XLA copy entirely.
    x = images_nchw.astype(jnp.bfloat16)
    patches = (x.reshape(B, Cin, H4, s, W4, s)
                 .transpose(0, 2, 4, 1, 3, 5)
                 .reshape(B, S, Cin * s * s))
    if s_pad != S:
        patches = jnp.pad(patches, ((0, 0), (0, s_pad - S), (0, 0)))
    patches = patches.reshape(B * s_pad, Cin * s * s)

    # Fused backbone: stem conv + 1x1 conv + head partial + masked GAP partial
    # sums, one HBM pass; `feat` never leaves VMEM.
    hp, psum = backbone_fused(
        patches, inf_params["w_stem_f"], inf_params["b_stem_f"],
        inf_params["w_bb_p"], inf_params["b_bb_p"], inf_params["w_head_p"],
        batch=B, s_pad=s_pad, tm=tm, s_valid=S)
    Cp = psum.shape[-1]
    nh_pad = hp.shape[-1]

    # GlobalContextModule: finish the GAP (tiny (B, n_tiles, Cp) reduction),
    # then gc-conv + head-weight fold on the pooled tensor -> per-image bias.
    pooled = psum.reshape(B, n_tiles, Cp).sum(axis=1) / float(S)     # (B, Cp) f32
    head_bias = gcm_head_bias(pooled, inf_params["w_gc_p"], inf_params["b_gc_p"],
                              inf_params["w_head_p"], inf_params["b_head_p"])

    # Epilogue: slice valid rows / channels, add the gc-dependent bias, back to
    # NCHW to match the PyTorch module's output convention.
    # TODO(synk): return NHWC (or per-head NHWC slices) if downstream consumers
    #             accept it to save this transpose pass.
    head = hp.reshape(B, s_pad, nh_pad)[:, :S, :n_head].astype(jnp.float32)
    head = head + head_bias[:, None, :n_head]
    head = head.reshape(B, H4, W4, n_head).transpose(0, 3, 1, 2)     # NCHW

    return {
        "sem_seg": head[:, 0:num_classes],                    # (B, 19, H/4, W/4)
        "center": head[:, num_classes:num_classes + 1],       # (B, 1,  H/4, W/4)
        "offset": head[:, num_classes + 1:num_classes + 3],   # (B, 2,  H/4, W/4)
        "depth": head[:, num_classes + 3:num_classes + 4],    # (B, 1,  H/4, W/4)
    }


# ----------------------------------------------------------------------------
if __name__ == "__main__":
    key = jax.random.PRNGKey(0)
    k_img, k_par = jax.random.split(key)

    # small, deterministic example inputs: batch=2, 3-channel 16x16 images in [0, 255]
    images = jax.random.uniform(k_img, (2, 3, 16, 16), jnp.float32) * 255.0
    params = make_params(k_par)
    inf_params = prepare_inference_params(params)

    outputs = mgnet_forward(images, inf_params)
    jax.block_until_ready(outputs)

    assert outputs["sem_seg"].shape == (2, 19, 4, 4)
    assert outputs["center"].shape == (2, 1, 4, 4)
    assert outputs["offset"].shape == (2, 2, 4, 4)
    assert outputs["depth"].shape == (2, 1, 4, 4)
    print("KERNEL_OK")
</pallas_src>

<mosaic_0001>
module attributes {stable_mosaic.version = 11 : i64} {
  func.func @_backbone_kernel(%arg0: i32, %arg1: i32, %arg2: memref<16x48xbf16, #tpu.memory_space<vmem>>, %arg3: memref<48x128xbf16, #tpu.memory_space<vmem>>, %arg4: memref<1x128xf32, #tpu.memory_space<vmem>>, %arg5: memref<128x128xbf16, #tpu.memory_space<vmem>>, %arg6: memref<1x128xf32, #tpu.memory_space<vmem>>, %arg7: memref<128x128xbf16, #tpu.memory_space<vmem>>, %arg8: memref<16x128xbf16, #tpu.memory_space<vmem>>, %arg9: memref<1x1x128xf32, #tpu.memory_space<vmem>>) attributes {dimension_semantics = [#tpu.dimension_semantics<parallel>, #tpu.dimension_semantics<parallel>], iteration_bounds = array<i64: 2, 1>, scalar_prefetch = 0 : i64, scratch_operands = 0 : i64, tpu.core_type = #tpu.core_type<tc>, window_params = [{transform_indices = @transform_0, window_bounds = array<i64: 16, 48>}, {pipeline_mode = #tpu.pipeline_mode<synchronous>, transform_indices = @transform_1, window_bounds = array<i64: 48, 128>}, {pipeline_mode = #tpu.pipeline_mode<synchronous>, transform_indices = @transform_2, window_bounds = array<i64: 1, 128>}, {pipeline_mode = #tpu.pipeline_mode<synchronous>, transform_indices = @transform_3, window_bounds = array<i64: 128, 128>}, {pipeline_mode = #tpu.pipeline_mode<synchronous>, transform_indices = @transform_4, window_bounds = array<i64: 1, 128>}, {pipeline_mode = #tpu.pipeline_mode<synchronous>, transform_indices = @transform_5, window_bounds = array<i64: 128, 128>}, {transform_indices = @transform_6, window_bounds = array<i64: 16, 128>}, {transform_indices = @transform_7, window_bounds = array<i64: 1, 1, 128>}]} {
    %c0 = arith.constant 0 : index
    %c0_0 = arith.constant 0 : index
    %0 = vector.load %arg2[%c0, %c0_0] : memref<16x48xbf16, #tpu.memory_space<vmem>>, vector<16x48xbf16>
    %c0_1 = arith.constant 0 : index
    %c0_2 = arith.constant 0 : index
    %1 = vector.load %arg3[%c0_1, %c0_2] : memref<48x128xbf16, #tpu.memory_space<vmem>>, vector<48x128xbf16>
    %cst = arith.constant dense<0.000000e+00> : vector<16x128xf32>
    %2 = tpu.matmul %0, %1, %cst {dimension_numbers = #tpu.dot_dimension_numbers<[1], [0], [0], [1], [0, 0, 1, 1], [], []>} : vector<16x48xbf16>, vector<48x128xbf16>, vector<16x128xf32> -> vector<16x128xf32>
    %c0_3 = arith.constant 0 : index
    %c0_4 = arith.constant 0 : index
    %3 = vector.load %arg4[%c0_3, %c0_4] : memref<1x128xf32, #tpu.memory_space<vmem>>, vector<1x128xf32>
    %4 = vector.broadcast %3 : vector<1x128xf32> to vector<16x128xf32>
    %5 = arith.addf %2, %4 : vector<16x128xf32>
    %cst_5 = arith.constant 0.000000e+00 : f32
    %6 = vector.broadcast %cst_5 : f32 to vector<16x128xf32>
    %7 = arith.maximumf %5, %6 : vector<16x128xf32>
    %8 = arith.truncf %7 : vector<16x128xf32> to vector<16x128xbf16>
    %c0_6 = arith.constant 0 : index
    %c0_7 = arith.constant 0 : index
    %9 = vector.load %arg5[%c0_6, %c0_7] : memref<128x128xbf16, #tpu.memory_space<vmem>>, vector<128x128xbf16>
    %cst_8 = arith.constant dense<0.000000e+00> : vector<16x128xf32>
    %10 = tpu.matmul %8, %9, %cst_8 {dimension_numbers = #tpu.dot_dimension_numbers<[1], [0], [0], [1], [0, 0, 1, 1], [], []>} : vector<16x128xbf16>, vector<128x128xbf16>, vector<16x128xf32> -> vector<16x128xf32>
    %c0_9 = arith.constant 0 : index
    %c0_10 = arith.constant 0 : index
    %11 = vector.load %arg6[%c0_9, %c0_10] : memref<1x128xf32, #tpu.memory_space<vmem>>, vector<1x128xf32>
    %12 = vector.broadcast %11 : vector<1x128xf32> to vector<16x128xf32>
    %13 = arith.addf %10, %12 : vector<16x128xf32>
    %cst_11 = arith.constant 0.000000e+00 : f32
    %14 = vector.broadcast %cst_11 : f32 to vector<16x128xf32>
    %15 = arith.maximumf %13, %14 : vector<16x128xf32>
    %16 = arith.truncf %15 : vector<16x128xf32> to vector<16x128xbf16>
    %c0_12 = arith.constant 0 : index
    %c0_13 = arith.constant 0 : index
    %17 = vector.load %arg7[%c0_12, %c0_13] : memref<128x128xbf16, #tpu.memory_space<vmem>>, vector<128x128xbf16>
    %cst_14 = arith.constant dense<0.000000e+00> : vector<16x128xf32>
    %18 = tpu.matmul %16, %17, %cst_14 {dimension_numbers = #tpu.dot_dimension_numbers<[1], [0], [0], [1], [0, 0, 1, 1], [], []>} : vector<16x128xbf16>, vector<128x128xbf16>, vector<16x128xf32> -> vector<16x128xf32>
    %19 = arith.truncf %18 : vector<16x128xf32> to vector<16x128xbf16>
    %c0_15 = arith.constant 0 : index
    %c0_16 = arith.constant 0 : index
    %20 = vector.load %arg8[%c0_15, %c0_16] : memref<16x128xbf16, #tpu.memory_space<vmem>>, vector<16x128xbf16>
    tpu.vector_store %arg8[%c0_15, %c0_16], %19 {strides = array<i32>} : memref<16x128xbf16, #tpu.memory_space<vmem>>, vector<16x128xbf16>,
    %c16_i32 = arith.constant 16 : i32
    %21 = arith.muli %arg1, %c16_i32 : i32
    %22 = tpu.iota {dimensions = array<i32: 0>} : vector<16x1xi32>
    %23 = vector.broadcast %21 : i32 to vector<16x1xi32>
    %24 = arith.addi %23, %22 : vector<16x1xi32>
    %c16_i32_17 = arith.constant 16 : i32
    %25 = vector.broadcast %c16_i32_17 : i32 to vector<16x1xi32>
    %26 = arith.cmpi slt, %24, %25 : vector<16x1xi32>
    %cst_18 = arith.constant 0.000000e+00 : f32
    %27 = vector.shape_cast %26 : vector<16x1xi1> to vector<16x1xi1>
    %28 = vector.broadcast %27 : vector<16x1xi1> to vector<16x128xi1>
    %29 = vector.broadcast %cst_18 : f32 to vector<16x128xf32>
    %30 = arith.select %28, %15, %29 : vector<16x128xi1>, vector<16x128xf32>
    %cst_19 = arith.constant dense<0.000000e+00> : vector<128xf32>
    %31 = vector.multi_reduction <add>, %30, %cst_19 [0] : vector<16x128xf32> to vector<128xf32>
    %32 = vector.shape_cast %31 : vector<128xf32> to vector<1x128xf32>
    %33 = vector.shape_cast %32 : vector<1x128xf32> to vector<1x1x128xf32>
    %c0_20 = arith.constant 0 : index
    %c0_21 = arith.constant 0 : index
    %c0_22 = arith.constant 0 : index
    %34 = vector.load %arg9[%c0_20, %c0_21, %c0_22] : memref<1x1x128xf32, #tpu.memory_space<vmem>>, vector<1x1x128xf32>
    tpu.vector_store %arg9[%c0_20, %c0_21, %c0_22], %33 {strides = array<i32>} : memref<1x1x128xf32, #tpu.memory_space<vmem>>, vector<1x1x128xf32>,
    return
  }
  func.func @transform_0(%arg0: i32, %arg1: i32) -> (i32, i32) {
    %c1_i32 = arith.constant 1 : i32
    %0 = arith.muli %arg0, %c1_i32 : i32
    %1 = arith.addi %0, %arg1 : i32
    %c0_i32 = arith.constant 0 : i32
    %c0_i32_0 = arith.constant 0 : i32
    return %1, %c0_i32 : i32, i32
  }
  func.func @transform_1(%arg0: i32, %arg1: i32) -> (i32, i32) {
    %c0_i32 = arith.constant 0 : i32
    %c0_i32_0 = arith.constant 0 : i32
    %c0_i32_1 = arith.constant 0 : i32
    return %c0_i32, %c0_i32_0 : i32, i32
  }
  func.func @transform_2(%arg0: i32, %arg1: i32) -> (i32, i32) {
    %c0_i32 = arith.constant 0 : i32
    %c0_i32_0 = arith.constant 0 : i32
    %c0_i32_1 = arith.constant 0 : i32
    return %c0_i32, %c0_i32_0 : i32, i32
  }
  func.func @transform_3(%arg0: i32, %arg1: i32) -> (i32, i32) {
    %c0_i32 = arith.constant 0 : i32
    %c0_i32_0 = arith.constant 0 : i32
    %c0_i32_1 = arith.constant 0 : i32
    return %c0_i32, %c0_i32_0 : i32, i32
  }
  func.func @transform_4(%arg0: i32, %arg1: i32) -> (i32, i32) {
    %c0_i32 = arith.constant 0 : i32
    %c0_i32_0 = arith.constant 0 : i32
    %c0_i32_1 = arith.constant 0 : i32
    return %c0_i32, %c0_i32_0 : i32, i32
  }
  func.func @transform_5(%arg0: i32, %arg1: i32) -> (i32, i32) {
    %c0_i32 = arith.constant 0 : i32
    %c0_i32_0 = arith.constant 0 : i32
    %c0_i32_1 = arith.constant 0 : i32
    return %c0_i32, %c0_i32_0 : i32, i32
  }
  func.func @transform_6(%arg0: i32, %arg1: i32) -> (i32, i32) {
    %c1_i32 = arith.constant 1 : i32
    %0 = arith.muli %arg0, %c1_i32 : i32
    %1 = arith.addi %0, %arg1 : i32
    %c0_i32 = arith.constant 0 : i32
    %c0_i32_0 = arith.constant 0 : i32
    return %1, %c0_i32 : i32, i32
  }
  func.func @transform_7(%arg0: i32, %arg1: i32) -> (i32, i32, i32) {
    %c1_i32 = arith.constant 1 : i32
    %0 = arith.muli %arg0, %c1_i32 : i32
    %1 = arith.addi %0, %arg1 : i32
    %c0_i32 = arith.constant 0 : i32
    %c0_i32_0 = arith.constant 0 : i32
    %c0_i32_1 = arith.constant 0 : i32
    return %1, %c0_i32, %c0_i32_0 : i32, i32, i32
  }
}

</mosaic_0001>

<bundles_post_ra>
// kernel: tpu_custom_call.1
= control target key start
LH: loop header
LB: loop body
LE: loop exit
PB: predicated region body
PF: predicated region fallthrough
CT: control target
= control target key end

     0   :  { %s1537_s0 = inlined_call_operand.hbm [shape: bf16[32,48], index: 0, kind: input, shape index: {}]   ;;  %s1538_s1 = inlined_call_operand.hbm [shape: bf16[48,128], index: 1, kind: input, shape index: {}]   ;;  %s1539_s2 = inlined_call_operand.vmem [shape: f32[1,128], index: 2, kind: input, shape index: {}]   ;;  %s1540_s3 = inlined_call_operand.hbm [shape: bf16[128,128], index: 3, kind: input, shape index: {}]   ;;  %s1541_s4 = inlined_call_operand.vmem [shape: f32[1,128], index: 4, kind: input, shape index: {}]   ;;  %s1542_s5 = inlined_call_operand.hbm [shape: bf16[128,128], index: 5, kind: input, shape index: {}]   ;;  %s1543_s6 = inlined_call_operand.hbm [shape: bf16[32,128], index: 6, kind: output, shape index: {0}]   ;;  %s1544_s7 = inlined_call_operand.hbm [shape: f32[2,1,128], index: 7, kind: output, shape index: {1}]  }
   0x1   :  { %1550 = sst [smem:[#allocation20_spill]] %s1538_s1 }
   0x2   :  { %1551 = sst [smem:[#allocation21_spill]] %s1540_s3 }
   0x3   :  { %1552 = sst [smem:[#allocation22_spill]] %s1542_s5 }
   0x4   :  { %13 = vsyncpa [#allocation3], 0 }
   0x5   :  { %15 = vsyncpa [#allocation3 + $0x1], 0 }
   0x6   :  { %16 = vsyncpa [#allocation6], 0 }
   0x7   :  { %17 = vsyncpa [#allocation9], 0 }
   0x8   :  { %18 = vsyncpa [#allocation4], 0 }
   0x9   :  { %20 = vsyncpa [#allocation4 + $0x1], 0 }
   0xa   :  { %21 = vsyncpa [#allocation12], 0 }
   0xb   :  { %23 = vsyncpa [#allocation12 + $0x1], 0  ;;  %s1330_s24 = smov 0   ;;  %s1332_s25 = smov 0  }
   0xc   :  { %s1334_s26 = smov 0   ;;  %s1336_s27 = smov 0  }
   0xd   :  { %s1338_s28 = smov 0   ;;  %s1340_s29 = smov 0  }
   0xe LB: > { %1553 = sst [smem:[#allocation18_spill]] %s1281_s29  ;;  %s806_s30 = sadd.s32 4294967295, %s1281_s29   ;;  %s1281_s29 = sphi %s1340_s29, %s29_s29   ;;  %s1277_s28 = sphi %s1338_s28, %s1574_s28   ;;  %s1273_s27 = sphi %s1336_s27, %s1573_s27   ;;  %s1269_s26 = sphi %s1334_s26, %s1572_s26   ;;  %s1265_s25 = sphi %s1332_s25, %s1571_s25   ;;  %s1261_s24 = sphi %s1330_s24, %s1570_s24  }
   0xf   : > { %s807_s8 = sadd.s32 4294967294, %s1281_s29   ;;  %p63_p0 = scmp.ne.s32.totalorder %s1265_s25, %s1261_s24 }
  0x10   : > { %p1364_p1 = scmp.eq.s32.totalorder %s806_s30, 0  ;;  %p1368_p2 = scmp.eq.s32.totalorder %s806_s30, 1 }
  0x11   : > { %p200_p3 = scmp.eq.s32.totalorder %s807_s8, 1  ;;  %p808_p5 = scmp.ge.s32.totalorder %s1281_s29, 1 }
  0x12   : > { %p1374_p4 = por %p1364_p1, %p63_p0  ;;  %p235_p7 = scmp.lt.s32.totalorder %s1281_s29, 3 }
  0x13   : > { %p1379_p6 = por %p200_p3, %p63_p0  ;;  %s1558_s1 = sld [smem:[#allocation20_spill]] }
  0x14   : > { %p1387_p8 = pnand %p808_p5, %p235_p7  ;;  %s1283_s17 = smov [#allocation5]  }
  0x15   : > { %s248_s18 = sshll.u32 %s1283_s17, 4  ;;  %p812_p11 = scmp.ge.s32.totalorder %s1281_s29, 2  ;;  %s249_s18 = int_to_ptr.vmem [resolvable:$true] %s248_s18 }
  0x16   : > { %p953_p9 = pneg %p1387_p8  ;;  %s1561_s3 = sld [smem:[#allocation21_spill]] }
  0x17   : > { %s1545_s23 = smov 64   ;;  %s1546_s30 = smov 4  }
  0x18   : > { %p1395_p10 = pnand %p953_p9, %p1364_p1  ;;  %s1286_s8 = smov [#allocation7]  }
  0x19   : > { %s246_s15 = sshll.u32 %s1558_s1, 4  ;;  %s265_s13 = sshll.u32 %s1286_s8, 4  ;;  %s247_s15 = int_to_ptr.hbm [resolvable:$true] %s246_s15  ;;  %s266_s13 = int_to_ptr.vmem [resolvable:$true] %s265_s13 }
  0x1a   : > { %956 = dma.hbm_to_vmem [thread:$0]  (!%p1395_p10), %s247_s15, 384, %s249_s18, [#allocation6], %s1545_s23, %s1545_s23, %s1546_s30  }
  0x1b   : > { %s1562_s5 = sld [smem:[#allocation22_spill]]  ;;  %s1287_s21 = smov [#allocation8]  }
  0x1c   : > { %s263_s22 = sshll.u32 %s1561_s3, 4  ;;  %s282_s1 = sshll.u32 %s1287_s21, 4  ;;  %s264_s22 = int_to_ptr.hbm [resolvable:$true] %s263_s22  ;;  %s283_s1 = int_to_ptr.vmem [resolvable:$true] %s282_s1 }
  0x1d   : > { %959 = dma.hbm_to_vmem [thread:$0]  (!%p1395_p10), %s264_s22, 1024, %s266_s13, [#allocation6], %s1545_s23, %s1545_s23, %s1546_s30  }
  0x1e   : > { %s41_s15 = sadd.s32 1, %s1277_s28  ;;  %s50_s18 = sadd.s32 1, %s1269_s26 }
  0x1f   : > { %p43_p12 = scmp.ge.s32.totalorder %s41_s15, 2  ;;  %p57_p13 = scmp.ne.s32.totalorder %s1269_s26, %s1265_s25 }
  0x20   : > { %p58_p0 = scmp.eq.s32.totalorder %s1281_s29, 0  ;;  %p977_p7 = scmp.lt.s32.totalorder %s1281_s29, 2 }
  0x21   : > { %s280_s20 = sshll.u32 %s1562_s5, 4  ;;  %s1576_s15 = smov (%p43_p12, %s41_s15), 0  ;;  %s281_s20 = int_to_ptr.hbm [resolvable:$true] %s280_s20 }
  0x22   : > { %962 = dma.hbm_to_vmem [thread:$0]  (!%p1395_p10), %s281_s20, 1024, %s283_s1, [#allocation9], %s1545_s23, %s1545_s23, %s1546_s30  }
  0x23   : > { %1563 = sst [smem:[#allocation19_spill]] %s1576_s15  ;;  %p1428_p3 = por %p58_p0, %p57_p13 }
  0x24   : > { %p1434_p5 = por %p1368_p2, %p57_p13  ;;  %s47_s8 = ssub.s32 %s1277_s28, %s1576_s15 }
  0x25   : > { %p48_p9 = scmp.eq.s32.totalorder %s47_s8, 0  ;;  %s296_s1 = sand.u32 1, %s1269_s26  }
  0x26   : > { %s813_s13 = sshll.u32 %s296_s1, 3  ;;  %s908_s17 = sshll.u32 %s1277_s28, 3 }
  0x27   : > { %s1443_s14 = scalar_select %p48_p9, %s1269_s26, %s50_s18  }
  0x28   : > { %s306_s23 = scalar_lea.hbm %s1537_s0, %s908_s17  ;;  %s300_s30 = scalar_lea.vmem [#allocation2], %s813_s13 }
  0x29   : > { %s309_s3 = sshll.u32 %s300_s30, 4  ;;  %s307_s10 = sshll.u32 %s306_s23, 4  ;;  %s310_s3 = int_to_ptr.vmem [resolvable:$true] %s309_s3  ;;  %s308_s10 = int_to_ptr.hbm [resolvable:$true] %s307_s10 }
  0x2a   : > { %p964_p2 = pnand %p977_p7, %p1428_p3  ;;  %s297_s5 = scalar_lea.sflag [#allocation3], %s296_s1 }
  0x2b   : > { %s1566_s15 = smov 4   ;;  %s1567_s29 = smov 64  }
  0x2c   : > { %966 = dma.hbm_to_vmem [thread:$0]  (!%p964_p2), %s308_s10, 128, %s310_s3, %s297_s5, %s1567_s29, %s1567_s29, %s1566_s15  }
  0x2d   : > { %321 = sbr.rel (%p1387_p8) target bundleno = 493 (0x1ed), region = 44  ;;  %s1457_s18 = sand.u32 (!%p1387_p8), 1, %s1265_s25  }
  0x2e   : > { %s817_s23 = sshll.u32 (!%p1387_p8), %s1457_s18, 3  ;;  %s324_s30 = scalar_lea.sflag (!%p1387_p8), [#allocation3], %s1457_s18 }
  0x2f   : > { %s327_s22 = scalar_lea.vmem (!%p1387_p8), [#allocation2], %s817_s23 }
  0x32   : > { %1240 = dma.done.wait (%p1374_p4), %s324_s30, 128  }
  0x33   : > { %1242 = vsyncadd (%p1374_p4), %s324_s30, 4294967168 }
  0x34   : > { %1244 = dma.done.wait (%p1364_p1), [#allocation6], 1408  }
  0x35   : > { %1246 = vsyncadd (%p1364_p1), [#allocation6], 4294965888 }
  0x36   : > { %1248 = dma.done.wait (%p1364_p1), [#allocation9], 1024  }
  0x37   : > { %1250 = vsyncadd (%p1364_p1), [#allocation9], 4294966272  ;;  %v912_v0 = vld [vmem:[#allocation5 + $0x10] sm:$0xff]  ;;  %v911_v2 = vld [vmem:[#allocation5 + $0x8] sm:$0xff]  ;;  %vm419_vm0 = vcmask 392192   ;;  %s377_s11 = scalar_lea.vmem [#allocation11], %s1457_s18  ;;  %s663_s8 = scalar_lea.hbm %s1544_s7, %s1273_s27 }
  0x38   : > { %v920_v1 = vld [vmem:[#allocation7 + $0x38] sm:$0xff]  ;;  %428 = vmatpush.bf16.msra.mxu0 %v912_v0  ;;  %v919_v3 = vld [vmem:[#allocation7 + $0x30] sm:$0xff]  ;;  %v910_v4 = vld [vmem:[#allocation5] sm:$0xff]  ;;  %s665_s1 = sshll.u32 %s377_s11, 4  ;;  %s667_s13 = sshll.u32 %s663_s8, 4  ;;  %s666_s1 = int_to_ptr.vmem [resolvable:$true] %s665_s1  ;;  %s668_s13 = int_to_ptr.hbm [resolvable:$true] %s667_s13 }
  0x39   : > { %508 = vmatpush.bf16.msra.mxu1 %v920_v1  ;;  %v918_v5 = vld [vmem:[#allocation7 + $0x28] sm:$0xff]  ;;  %v909_v6 = vld [vmem:[%s327_s22] sm:$0xff]  ;;  %v915_v9 = vld [vmem:[#allocation7 + $0x10] sm:$0xff]  ;;  %s636_s17 = scalar_lea.sflag [#allocation12], %s1457_s18  ;;  %s1173_s20 = sshra.s32 %s668_s13, 4  ;;  %s1174_s20 = int_to_ptr.hbm [resolvable:$true] %s1173_s20 }
  0x3a   : > { %v917_v7 = vld [vmem:[#allocation7 + $0x20] sm:$0xff]  ;;  %v916_v8 = vld [vmem:[#allocation7 + $0x18] sm:$0xff]  ;;  %v914_v10 = vld [vmem:[#allocation7 + $0x8] sm:$0xff]  ;;  %s1175_s21 = scalar_lea.hbm %s1174_s20, 1  ;;  %s1179_s22 = scalar_lea.hbm %s1544_s7, 2 }
  0x3b   : > { %v913_v11 = vld [vmem:[#allocation7] sm:$0xff]  ;;  %v928_v12 = vld [vmem:[#allocation8 + $0x38] sm:$0xff]  ;;  %v927_v13 = vld [vmem:[#allocation8 + $0x30] sm:$0xff]  ;;  %p1176_p1 = scmp.ne.s32.totalorder %s1174_s20, %s1175_s21  ;;  %p1180_p10 = scmp.lt.s32.totalorder %s1174_s20, %s1544_s7 }
  0x3c   : > { %429 = vmatpush.bf16.msra.mxu0 %v911_v2  ;;  %589 = vmatpush.bf16.msra.mxu2 %v928_v12  ;;  %v926_v14 = vld [vmem:[#allocation8 + $0x28] sm:$0xff]  ;;  %v925_v15 = vld [vmem:[#allocation8 + $0x20] sm:$0xff]  ;;  %v1037_v17 = vld [vmem:[%s1539_s2] ss:$0 sm:$0xff]  ;;  %p1181_p12 = scmp.lt.s32.totalorder %s1179_s22, %s1175_s21 }
  0x3d   : > { %509 = vmatpush.bf16.msra.mxu1 %v919_v3  ;;  %v924_v24 = vld [vmem:[#allocation8 + $0x18] sm:$0xff]  ;;  %v923_v25 = vld [vmem:[#allocation8 + $0x10] sm:$0xff]  ;;  %v922_v26 = vld [vmem:[#allocation8 + $0x8] sm:$0xff]  ;;  %p1177_p4 = pnand %p1176_p1, %p1434_p5 }
  0x3e   : > { %v921_v27 = vld [vmem:[#allocation8] sm:$0xff]  ;;  %v1038_v29 = vld [vmem:[%s1541_s4] ss:$0 sm:$0xff]  ;;  %p1182_p13 = por %p1181_p12, %p1180_p10 }
  0x3f   : > { %p1178_p8 = pneg %p1177_p4 }
  0x40   : > { %430 = vmatpush.bf16.msra.mxu0 %v910_v4  ;;  %590 = vmatpush.bf16.msra.mxu2 %v927_v13 }
  0x41   : > { %510 = vmatpush.bf16.msra.mxu1 %v918_v5  ;;  %p1183_p0 = pnand %p1182_p13, %p1178_p8 }
  0x43   : > { %838 = vmatmul.msk.bf16.vlgmr.msra.gmra.mxu0 %vm419_vm0, %v909_v6 }
  0x44   : > { %591 = vmatpush.bf16.msra.mxu2 %v926_v14 }
  0x45   : > { %511 = vmatpush.bf16.msra.mxu1 %v917_v7 }
  0x48   : > { %592 = vmatpush.bf16.msra.mxu2 %v925_v15 }
  0x49   : > { %512 = vmatpush.bf16.msra.mxu1 %v916_v8 }
  0x4c   : > { %593 = vmatpush.bf16.msra.mxu2 %v924_v24 }
  0x4d   : > { %513 = vmatpush.bf16.msra.mxu1 %v915_v9 }
  0x50   : > { %594 = vmatpush.bf16.msra.mxu2 %v923_v25 }
  0x51   : > { %514 = vmatpush.bf16.msra.mxu1 %v914_v10 }
  0x54   : > { %595 = vmatpush.bf16.msra.mxu2 %v922_v26 }
  0x55   : > { %515 = vmatpush.bf16.msra.mxu1 %v913_v11 }
  0x58   : > { %596 = vmatpush.bf16.msra.mxu2 %v921_v27 }
  0xc0   : > { %v432_v16 = vpop.f32.mrf.mxu0 }
  0xc1   : > { %v433_v18 = vadd.f32 %v1037_v17, %v432_v16 }
  0xc3   : > { %v437_v21 = vmax.f32 %v433_v18, 0.0 }
  0xc8   : > { %v434_v19 = vpop.f32.mrf.mxu0 }
  0xc9   : > { %v435_v20 = vadd.f32 %v1037_v17, %v434_v19 }
  0xcb   : > { %v438_v22 = vmax.f32 %v435_v20, 0.0 }
  0xcd   : > { %v439_v23 = vpack.c.bf16 %v438_v22, %v437_v21 }
  0xcf   : > { %516 = vmatmul.bf16.vlgmr.msra.gmra.mxu1 %v439_v23 }
 0x14c   : > { %v517_v28 = vpop.f32.mrf.mxu1 }
 0x14d   : > { %v518_v30 = vadd.f32 %v1038_v29, %v517_v28 }
 0x14f   : > { %v522_v33 = vmax.f32 %v518_v30, 0.0 }
 0x154   : > { %v519_v31 = vpop.f32.mrf.mxu1 }
 0x155   : > { %v520_v32 = vadd.f32 %v1038_v29, %v519_v31 }
 0x157   : > { %v523_v34 = vmax.f32 %v520_v32, 0.0 }
 0x159   : > { %v622_v35 = vadd.f32 %v523_v34, %v522_v33  ;;  %v524_v36 = vpack.c.bf16 %v523_v34, %v522_v33 }
 0x15b   : > { %v623_v37 = vrot.slane %v622_v35, 4  ;;  %597 = vmatmul.bf16.vlgmr.msra.gmra.mxu2 %v524_v36 }
 0x15d   : > { %v624_v38 = vadd.f32 %v623_v37, %v622_v35 }
 0x15f   : > { %v625_v39 = vrot.slane %v624_v38, 2 }
 0x161   : > { %v626_v40 = vadd.f32 %v625_v39, %v624_v38 }
 0x163   : > { %v627_v41 = vrot.slane %v626_v40, 1 }
 0x165   : > { %v628_v42 = vadd.f32 %v627_v41, %v626_v40 }
 0x167   : > { %629 = vst [vmem:[%s377_s11] sm:$0x1] %v628_v42 }
 0x168   : > { %1186 = shalt.err (!%p1183_p0)
}
 0x169   : > { %950 = dma.vmem_to_hbm [thread:$0]  (%p1434_p5), %s666_s1, 16, %s668_s13, %s636_s17  }
 0x16a   : > { %s929_s29 = sshll.u32 %s1273_s27, 3  ;;  %s371_s15 = scalar_lea.vmem [#allocation10], %s817_s23 }
 0x16b   : > { %s647_s16 = scalar_lea.hbm %s1543_s6, %s929_s29  ;;  %s648_s8 = sshll.u32 %s371_s15, 4  ;;  %s649_s8 = int_to_ptr.vmem [resolvable:$true] %s648_s8 }
 0x16c   : > { %s650_s20 = sshll.u32 %s647_s16, 4  ;;  %s631_s21 = scalar_lea.sflag [#allocation4], %s1457_s18  ;;  %s651_s20 = int_to_ptr.hbm [resolvable:$true] %s650_s20 }
 0x16d   : > { %s1201_s10 = sshra.s32 %s651_s20, 4  ;;  %s1207_s17 = scalar_lea.hbm %s1543_s6, 16  ;;  %s1202_s10 = int_to_ptr.hbm [resolvable:$true] %s1201_s10 }
 0x16e   : > { %s1203_s1 = scalar_lea.hbm %s1202_s10, 8  ;;  %p1208_p2 = scmp.lt.s32.totalorder %s1202_s10, %s1543_s6 }
 0x16f   : > { %p1204_p3 = scmp.ne.s32.totalorder %s1202_s10, %s1203_s1  ;;  %p1209_p1 = scmp.lt.s32.totalorder %s1207_s17, %s1203_s1 }
 0x171   : > { %p1205_p7 = pnand %p1204_p3, %p1434_p5  ;;  %p1210_p4 = por %p1209_p1, %p1208_p2 }
 0x173   : > { %p1206_p9 = pneg %p1205_p7 }
 0x175   : > { %p1211_p8 = pnand %p1210_p4, %p1206_p9 }
 0x1de   : > { %v598_v43 = vpop.f32.mrf.mxu2 }
 0x1e6   : > { %v600_v44 = vpop.f32.mrf.mxu2 }
 0x1e7   : > { %v933_v45 = vpack.c.bf16 %v600_v44, %v598_v43 }
 0x1e9   : > { %934 = vst [vmem:[%s371_s15] sm:$0xff] %v933_v45  }
 0x1ea   : > { %1214 = shalt.err (!%p1211_p8)
}
 0x1eb   : > { %s1288_s18 = smov 64   ;;  %s1289_s22 = smov 4  }
 0x1ec   : > { %949 = dma.vmem_to_hbm [thread:$0]  (%p1434_p5), %s649_s8, 128, %s651_s20, %s631_s21, %s1288_s18, %s1288_s18, %s1289_s22  }
 0x1ed PF: > { %s1568_s3 = sld [smem:[#allocation18_spill]]  ;;  %s679_s5 = sand.u32 1, %s1261_s24  }
 0x1ee   : > { %p968_p10 = pnand %p812_p11, %p1379_p6  ;;  %s680_s29 = scalar_lea.sflag [#allocation4], %s679_s5 }
 0x1f0   : > { %p969_p12 = pneg %p968_p10 }
 0x1f2   : > { %1252 = dma.done.wait (%p969_p12), %s680_s29, 128  }
 0x1f3   : > { %1254 = vsyncadd (%p969_p12), %s680_s29, 4294967168  ;;  %s690_s9 = scalar_lea.sflag [#allocation12], %s679_s5 }
 0x1f4   : > { %1256 = dma.done.wait (%p969_p12), %s690_s9, 16  }
 0x1f5   : > { %1258 = vsyncadd (%p969_p12), %s690_s9, 4294967280  ;;  %s29_s29 = sadd.s32 1, %s1568_s3   ;;  %s1569_s19 = sld [smem:[#allocation19_spill]] }
 0x1f6   : > { %p26_p13 = scmp.ge.s32.totalorder %s29_s29, 4   ;;  %s1570_s24 = smov %s1265_s25 }
 0x1f7   : > { %s1571_s25 = smov %s1269_s26  ;;  %s1572_s26 = smov %s1443_s14 }
 0x1f8   : > { %s1573_s27 = smov %s1277_s28  ;;  %28 = sbr.rel (!%p26_p13) target bundleno = 14 (0xe), region = 118 }
 0x1fb   : > { %s1574_s28 = smov %s1569_s19 }
 0x1fd   :  { %695 = vsyncpa [#allocation3], 1 }
 0x1fe   :  { %697 = vsyncpa [#allocation3 + $0x1], 1 }
 0x1ff   :  { %698 = vsyncpa [#allocation6], 1 }
 0x200   :  { %699 = vsyncpa [#allocation9], 1 }
 0x201   :  { %700 = vsyncpa [#allocation4], 1 }
 0x202   :  { %702 = vsyncpa [#allocation4 + $0x1], 1 }
 0x203   :  { %703 = vsyncpa [#allocation12], 1 }
 0x204   :  { %705 = vsyncpa [#allocation12 + $0x1], 1 }

</bundles_post_ra>
